<compile_context>
chip_gen: v6e
topology: v6e:2x2x1
jax: 0.10.0
libtpu: 0.0.40
codegen_flags: <defaults>
</compile_context>

<pallas_src>
import jax
import jax.numpy as jnp
from jax.experimental import pallas as pl
from jax.experimental.pallas import tpu as pltpu

# ---- model sizes (small, consistent with the module's forward) -------------
B = 2                      # batch
T = 8                      # sequence length == n_size (PE broadcast requires it)
BT = B * T
D_MODEL = 16
FULL = 2 * D_MODEL         # full_dims = 32
D_HIDDEN = 32
NEXT_ACT = 10              # next_activity
AC_VOCAB = 12
N_HEADS = 2
HEAD_DIM = FULL // N_HEADS
LN_EPS = 1e-5
LANES = 128

# ---- packed static slab layout: (row, lane) offsets within (104, 128) ------
# Stripe 0: rows 0:32
R_WQKV, L_WQKV = 0, 0       # (FULL, 3*FULL)=(32,96)  [Wq*scale | Wk | Wv]
R_W1,   L_W1   = 0, 96      # (FULL, D_HIDDEN)=(32,32)
# Stripe 1: rows 32:64
R_WO,   L_WO   = 32, 0      # (FULL, FULL)=(32,32)
R_W2,   L_W2   = 32, 32     # (D_HIDDEN, FULL)=(32,32)
R_WA1,  L_WA1  = 32, 64     # (FULL, D_HIDDEN)=(32,32)
R_WT1A, L_WT1A = 32, 96     # (FULL, D_HIDDEN)=(32,32)   = Wt1[:FULL]
# Stripe 2: rows 64:96
R_WT1B, L_WT1B = 64, 0      # (D_MODEL, D_HIDDEN)=(16,32) = Wt1[FULL:]
R_PE,   L_PE   = 80, 0      # (BT, FULL)=(16,32) positional encoding, batch-tiled
R_WA2,  L_WA2  = 64, 32     # (D_HIDDEN, NEXT_ACT)=(32,10)
R_WTO,  L_WTO  = 64, 48     # (D_HIDDEN, 1)=(32,1)
R_MASK, L_MASK = 64, 64     # (BT, BT)=(16,16) cross-batch -1e9 attention mask
R_SUM,  L_SUM  = 64, 96     # (B, BT)=(2,16) block-ones "sum over T" matrix
# Bias rows: rows 96:104
R_BQKV, L_BQKV = 96, 0      # (1, 96)  [bq*scale | bk | bv]
R_BO,   L_BO   = 96, 96     # (1, FULL)
R_B1,   L_B1   = 97, 0      # (1, D_HIDDEN)
R_B2,   L_B2   = 97, 32     # (1, FULL)
R_BA1,  L_BA1  = 97, 64     # (1, D_HIDDEN)
R_BT1,  L_BT1  = 97, 96     # (1, D_HIDDEN)
R_BA2,  L_BA2  = 98, 0      # (1, NEXT_ACT)
R_BTO,  L_BTO  = 98, 16     # (1, 1)
TOTAL_ROWS = 104

# ---- merged output slab layout: (48, 128) -----------------------------------
OUT_R_ACT = 0               # rows 0:2,  lanes 0:NEXT_ACT
OUT_R_TIME = 8              # rows 8:10, lanes 0:1
OUT_R_ATT = 16              # rows 16:48, lanes 0:BT  (head 0 then head 1)
OUT_ROWS = 48


# ---------------------------------------------------------------------------
# Pallas kernel: single invocation, whole batch, one dynamic input + one slab.
# ---------------------------------------------------------------------------
def transformer_nr_kernel(x_ref, slab_ref, out_ref):
    x_raw = x_ref[...]                                       # (BT, FULL) concat(ac, t) embeddings
    pe = slab_ref[R_PE:R_PE + BT, L_PE:L_PE + FULL]          # (BT, FULL)
    x = x_raw + pe                                           # positional-encoded input
    te = x_raw[:, D_MODEL:FULL]                              # (BT, D_MODEL) time embeddings

    # ---- fused QKV projection (scale pre-folded into Wq / bq) ---------------
    wqkv = slab_ref[R_WQKV:R_WQKV + FULL, L_WQKV:L_WQKV + 3 * FULL]      # (32, 96)
    bqkv = slab_ref[R_BQKV:R_BQKV + 1, L_BQKV:L_BQKV + 3 * FULL]         # (1, 96)
    qkv = jnp.dot(x, wqkv, preferred_element_type=jnp.float32) + bqkv    # (BT, 96)

    mask = slab_ref[R_MASK:R_MASK + BT, L_MASK:L_MASK + BT]              # (BT, BT)
    bo = slab_ref[R_BO:R_BO + 1, L_BO:L_BO + FULL]                       # (1, FULL)

    # ---- per-head attention over the whole folded batch ---------------------
    att = None
    for h in range(N_HEADS):
        c = h * HEAD_DIM
        q_h = qkv[:, c:c + HEAD_DIM]                                     # (BT, Hd), pre-scaled
        k_h = qkv[:, FULL + c:FULL + c + HEAD_DIM]                       # (BT, Hd)
        v_h = qkv[:, 2 * FULL + c:2 * FULL + c + HEAD_DIM]               # (BT, Hd)
        s_h = jax.lax.dot_general(q_h, k_h, (((1,), (1,)), ((), ())),
                                  preferred_element_type=jnp.float32)    # (BT, BT)
        s_h = s_h + mask                                                 # kill cross-batch scores
        s_h = s_h - jnp.max(s_h, axis=-1, keepdims=True)
        p_h = jnp.exp(s_h)                                               # cross-batch -> exactly 0
        p_h = p_h * pl.reciprocal(jnp.sum(p_h, axis=-1, keepdims=True), approx=False)
        out_ref[OUT_R_ATT + h * BT:OUT_R_ATT + (h + 1) * BT, 0:BT] = p_h
        pv_h = jnp.dot(p_h, v_h, preferred_element_type=jnp.float32)     # (BT, Hd)
        wo_h = slab_ref[R_WO + c:R_WO + c + HEAD_DIM, L_WO:L_WO + FULL]  # (Hd, FULL)
        contrib = jnp.dot(pv_h, wo_h, preferred_element_type=jnp.float32)
        att = contrib if att is None else att + contrib
    att = att + bo                                                       # (BT, FULL)

    # ---- add & layernorm (a)  (fresh LayerNorm: gamma=1, beta=0) ------------
    ya = x + att
    mu = jnp.mean(ya, axis=-1, keepdims=True)
    var = jnp.mean((ya - mu) ** 2, axis=-1, keepdims=True)
    out_a = (ya - mu) * jax.lax.rsqrt(var + LN_EPS)

    # ---- feedforward + add & layernorm (b) ----------------------------------
    w1 = slab_ref[R_W1:R_W1 + FULL, L_W1:L_W1 + D_HIDDEN]
    b1 = slab_ref[R_B1:R_B1 + 1, L_B1:L_B1 + D_HIDDEN]
    w2 = slab_ref[R_W2:R_W2 + D_HIDDEN, L_W2:L_W2 + FULL]
    b2 = slab_ref[R_B2:R_B2 + 1, L_B2:L_B2 + FULL]
    h1 = jnp.maximum(jnp.dot(out_a, w1, preferred_element_type=jnp.float32) + b1, 0.0)
    ff = jnp.dot(h1, w2, preferred_element_type=jnp.float32) + b2
    yb = out_a + ff
    mu2 = jnp.mean(yb, axis=-1, keepdims=True)
    var2 = jnp.mean((yb - mu2) ** 2, axis=-1, keepdims=True)
    c_t = (yb - mu2) * jax.lax.rsqrt(var2 + LN_EPS)                      # (BT, FULL)

    # ---- per-batch sum over T on the MXU via block-ones selection matrix ----
    sum_sel = slab_ref[R_SUM:R_SUM + B, L_SUM:L_SUM + BT]                # (B, BT)
    context = jnp.dot(sum_sel, c_t, preferred_element_type=jnp.float32)  # (B, FULL)

    # ---- activity head -------------------------------------------------------
    wa1 = slab_ref[R_WA1:R_WA1 + FULL, L_WA1:L_WA1 + D_HIDDEN]
    ba1 = slab_ref[R_BA1:R_BA1 + 1, L_BA1:L_BA1 + D_HIDDEN]
    wa2 = slab_ref[R_WA2:R_WA2 + D_HIDDEN, L_WA2:L_WA2 + NEXT_ACT]
    ba2 = slab_ref[R_BA2:R_BA2 + 1, L_BA2:L_BA2 + NEXT_ACT]
    a1 = jnp.maximum(jnp.dot(context, wa1, preferred_element_type=jnp.float32) + ba1, 0.0)
    out_ref[OUT_R_ACT:OUT_R_ACT + B, 0:NEXT_ACT] = (
        jnp.dot(a1, wa2, preferred_element_type=jnp.float32) + ba2)      # (B, NEXT_ACT)

    # ---- time head: concat(c_t, te) @ Wt1 split into two matmuls ------------
    wt1a = slab_ref[R_WT1A:R_WT1A + FULL, L_WT1A:L_WT1A + D_HIDDEN]
    wt1b = slab_ref[R_WT1B:R_WT1B + D_MODEL, L_WT1B:L_WT1B + D_HIDDEN]
    bt1 = slab_ref[R_BT1:R_BT1 + 1, L_BT1:L_BT1 + D_HIDDEN]
    ft = jnp.maximum(
        jnp.dot(c_t, wt1a, preferred_element_type=jnp.float32)
        + jnp.dot(te, wt1b, preferred_element_type=jnp.float32) + bt1, 0.0)  # (BT, D_HIDDEN)
    fsum = jnp.dot(sum_sel, ft, preferred_element_type=jnp.float32)          # (B, D_HIDDEN)
    wto = slab_ref[R_WTO:R_WTO + D_HIDDEN, L_WTO:L_WTO + 1]
    bto = slab_ref[R_BTO:R_BTO + 1, L_BTO:L_BTO + 1]
    out_ref[OUT_R_TIME:OUT_R_TIME + B, 0:1] = (
        jnp.dot(fsum, wto, preferred_element_type=jnp.float32) + bto)        # (B, 1)


# ---------------------------------------------------------------------------
# Host-side helpers
# ---------------------------------------------------------------------------
def positional_encoding(d_model, max_length):
    even_i = jnp.arange(0, d_model, 2, dtype=jnp.float32)
    denom = jnp.power(10000.0, even_i / d_model)
    pos = jnp.arange(max_length, dtype=jnp.float32).reshape(max_length, 1)
    even_pe = jnp.sin(pos / denom)
    odd_pe = jnp.cos(pos / denom)
    stacked = jnp.stack([even_pe, odd_pe], axis=2)
    pe = stacked.reshape(max_length, -1)[:, :d_model]
    return pe


def init_params(key):
    names_shapes = [
        ("emb", (AC_VOCAB, D_MODEL)),
        ("t_w", (1, D_MODEL)), ("t_b", (D_MODEL,)),
        ("wq", (FULL, FULL)), ("bq", (1, FULL)),
        ("wk", (FULL, FULL)), ("bk", (1, FULL)),
        ("wv", (FULL, FULL)), ("bv", (1, FULL)),
        ("wo", (FULL, FULL)), ("bo", (1, FULL)),
        ("w1", (FULL, D_HIDDEN)), ("b1", (1, D_HIDDEN)),
        ("w2", (D_HIDDEN, FULL)), ("b2", (1, FULL)),
        ("wa1", (FULL, D_HIDDEN)), ("ba1", (1, D_HIDDEN)),
        ("wa2", (D_HIDDEN, NEXT_ACT)), ("ba2", (1, NEXT_ACT)),
        ("wt1", (3 * D_MODEL, D_HIDDEN)), ("bt1", (1, D_HIDDEN)),
        ("wto", (D_HIDDEN, 1)), ("bto", (1, 1)),
    ]
    keys = jax.random.split(key, len(names_shapes))
    params = {}
    for (name, shape), k in zip(names_shapes, keys):
        params[name] = (jax.random.normal(k, shape, jnp.float32) * 0.05)
    return params


def pack_static_slab(params):
    """Pack all static data (weights, biases, PE, mask, sum-selector) ONCE."""
    slab = jnp.zeros((TOTAL_ROWS, LANES), jnp.float32)

    def put(s, r, l, block):
        return s.at[r:r + block.shape[0], l:l + block.shape[1]].set(block)

    scale = 1.0 / float(HEAD_DIM) ** 0.5
    wqkv = jnp.concatenate([params["wq"] * scale, params["wk"], params["wv"]], axis=1)
    bqkv = jnp.concatenate([params["bq"] * scale, params["bk"], params["bv"]], axis=1)
    slab = put(slab, R_WQKV, L_WQKV, wqkv)
    slab = put(slab, R_W1, L_W1, params["w1"])
    slab = put(slab, R_WO, L_WO, params["wo"])
    slab = put(slab, R_W2, L_W2, params["w2"])
    slab = put(slab, R_WA1, L_WA1, params["wa1"])
    slab = put(slab, R_WT1A, L_WT1A, params["wt1"][:FULL])
    slab = put(slab, R_WT1B, L_WT1B, params["wt1"][FULL:])
    slab = put(slab, R_PE, L_PE, jnp.tile(positional_encoding(FULL, T), (B, 1)))
    slab = put(slab, R_WA2, L_WA2, params["wa2"])
    slab = put(slab, R_WTO, L_WTO, params["wto"])
    # cross-batch attention mask (0 within a batch's T-block, -1e9 across)
    rb = jnp.repeat(jnp.arange(B), T)
    mask = jnp.where(rb[:, None] == rb[None, :], 0.0, -1e9).astype(jnp.float32)
    slab = put(slab, R_MASK, L_MASK, mask)
    slab = put(slab, R_SUM, L_SUM, jnp.repeat(jnp.eye(B, dtype=jnp.float32), T, axis=1))
    # biases
    slab = put(slab, R_BQKV, L_BQKV, bqkv)
    slab = put(slab, R_BO, L_BO, params["bo"])
    slab = put(slab, R_B1, L_B1, params["b1"])
    slab = put(slab, R_B2, L_B2, params["b2"])
    slab = put(slab, R_BA1, L_BA1, params["ba1"])
    slab = put(slab, R_BT1, L_BT1, params["bt1"])
    slab = put(slab, R_BA2, L_BA2, params["ba2"])
    slab = put(slab, R_BTO, L_BTO, params["bto"])
    return slab


@jax.jit
def transformer_nr_forward(slab, ac_emb, t_w, t_b, x_ac, x_t):
    # ---- per-call glue: embedding gather + time linear + concat + fold ------
    ac_embs = jnp.take(ac_emb, x_ac.astype(jnp.int32), axis=0)           # (B,T,D_MODEL)
    t_in = x_t[..., None].astype(jnp.float32)                            # (B,T,1)
    t_embs = jnp.dot(t_in, t_w) + t_b                                    # (B,T,D_MODEL)
    full_raw = jnp.concatenate([ac_embs, t_embs], axis=-1).astype(jnp.float32)
    x2d = full_raw.reshape(BT, FULL)                                     # (16, 32), no PE yet

    vmem = pl.BlockSpec(memory_space=pltpu.MemorySpace.VMEM)
    out = pl.pallas_call(
        transformer_nr_kernel,
        out_shape=jax.ShapeDtypeStruct((OUT_ROWS, LANES), jnp.float32),  # single output slab
        in_specs=[vmem, vmem],
        out_specs=vmem,
    )(x2d, slab)

    act_output = out[OUT_R_ACT:OUT_R_ACT + B, :NEXT_ACT]                 # (B, NEXT_ACT)
    time_output = out[OUT_R_TIME:OUT_R_TIME + B, :1]                     # (B, 1)
    p_heads = out[OUT_R_ATT:OUT_R_ATT + N_HEADS * BT, :BT].reshape(N_HEADS, BT, BT)
    att_weights = jnp.stack(
        [jnp.stack([p_heads[h, b * T:(b + 1) * T, b * T:(b + 1) * T]
                    for h in range(N_HEADS)], axis=0)
         for b in range(B)], axis=0)                                     # (B, H, T, T)
    return act_output, time_output, att_weights


if __name__ == "__main__":
    key = jax.random.PRNGKey(0)
    k_ac, k_t, k_p = jax.random.split(key, 3)
    x_ac = jax.random.randint(k_ac, (B, T), 0, AC_VOCAB)       # activity ids
    x_t = jax.random.uniform(k_t, (B, T), jnp.float32)         # time features
    params = init_params(k_p)

    # static packing hoisted out of the per-call path (done once)
    slab = jax.block_until_ready(pack_static_slab(params))

    act_output, time_output, att_weights = transformer_nr_forward(
        slab, params["emb"], params["t_w"], params["t_b"], x_ac, x_t)
    jax.block_until_ready((act_output, time_output, att_weights))

    assert act_output.shape == (B, NEXT_ACT)
    assert time_output.shape == (B, 1)
    assert att_weights.shape == (B, N_HEADS, T, T)
    # attention rows must sum to 1 (exact reciprocal in the softmax)
    assert jnp.allclose(att_weights.sum(-1), 1.0, atol=1e-3)
    print("KERNEL_OK")
</pallas_src>

<mosaic_0001>
module attributes {stable_mosaic.version = 11 : i64} {
  func.func @transformer_nr_kernel(%arg0: memref<16x32xf32, #tpu.memory_space<vmem>>, %arg1: memref<104x128xf32, #tpu.memory_space<vmem>>, %arg2: memref<48x128xf32, #tpu.memory_space<vmem>>) attributes {dimension_semantics = [], scalar_prefetch = 0 : i64, scratch_operands = 0 : i64, tpu.core_type = #tpu.core_type<tc>} {
    %c0 = arith.constant 0 : index
    %c0_0 = arith.constant 0 : index
    %0 = vector.load %arg0[%c0, %c0_0] : memref<16x32xf32, #tpu.memory_space<vmem>>, vector<16x32xf32>
    %c80 = arith.constant 80 : index
    %c0_1 = arith.constant 0 : index
    %1 = vector.load %arg1[%c80, %c0_1] : memref<104x128xf32, #tpu.memory_space<vmem>>, vector<16x32xf32>
    %2 = arith.addf %0, %1 : vector<16x32xf32>
    %3 = vector.extract_strided_slice %0 {offsets = [0, 16], sizes = [16, 16], strides = [1, 1]} : vector<16x32xf32> to vector<16x16xf32>
    %c0_2 = arith.constant 0 : index
    %c0_3 = arith.constant 0 : index
    %4 = vector.load %arg1[%c0_2, %c0_3] : memref<104x128xf32, #tpu.memory_space<vmem>>, vector<32x96xf32>
    %c96 = arith.constant 96 : index
    %c0_4 = arith.constant 0 : index
    %5 = vector.load %arg1[%c96, %c0_4] : memref<104x128xf32, #tpu.memory_space<vmem>>, vector<1x96xf32>
    %cst = arith.constant dense<0.000000e+00> : vector<16x96xf32>
    %6 = tpu.matmul %2, %4, %cst {dimension_numbers = #tpu.dot_dimension_numbers<[1], [0], [0], [1], [0, 0, 1, 1], [], []>} : vector<16x32xf32>, vector<32x96xf32>, vector<16x96xf32> -> vector<16x96xf32>
    %7 = vector.broadcast %5 : vector<1x96xf32> to vector<16x96xf32>
    %8 = arith.addf %6, %7 : vector<16x96xf32>
    %c64 = arith.constant 64 : index
    %c64_5 = arith.constant 64 : index
    %9 = vector.load %arg1[%c64, %c64_5] : memref<104x128xf32, #tpu.memory_space<vmem>>, vector<16x16xf32>
    %c96_6 = arith.constant 96 : index
    %c96_7 = arith.constant 96 : index
    %10 = vector.load %arg1[%c96_6, %c96_7] : memref<104x128xf32, #tpu.memory_space<vmem>>, vector<1x32xf32>
    %11 = vector.extract_strided_slice %8 {offsets = [0, 0], sizes = [16, 16], strides = [1, 1]} : vector<16x96xf32> to vector<16x16xf32>
    %12 = vector.extract_strided_slice %8 {offsets = [0, 32], sizes = [16, 16], strides = [1, 1]} : vector<16x96xf32> to vector<16x16xf32>
    %13 = vector.extract_strided_slice %8 {offsets = [0, 64], sizes = [16, 16], strides = [1, 1]} : vector<16x96xf32> to vector<16x16xf32>
    %cst_8 = arith.constant dense<0.000000e+00> : vector<16x16xf32>
    %14 = tpu.matmul %11, %12, %cst_8 {dimension_numbers = #tpu.dot_dimension_numbers<[1], [1], [0], [0], [0, 0, 1, 0], [], []>} : vector<16x16xf32>, vector<16x16xf32>, vector<16x16xf32> -> vector<16x16xf32>
    %15 = arith.addf %14, %9 : vector<16x16xf32>
    %cst_9 = arith.constant dense<0xFF800000> : vector<16xf32>
    %16 = vector.multi_reduction <maximumf>, %15, %cst_9 [1] : vector<16x16xf32> to vector<16xf32>
    %17 = vector.shape_cast %16 : vector<16xf32> to vector<16x1xf32>
    %18 = vector.broadcast %17 : vector<16x1xf32> to vector<16x16xf32>
    %19 = arith.subf %15, %18 : vector<16x16xf32>
    %20 = math.exp %19 : vector<16x16xf32>
    %cst_10 = arith.constant dense<0.000000e+00> : vector<16xf32>
    %21 = vector.multi_reduction <add>, %20, %cst_10 [1] : vector<16x16xf32> to vector<16xf32>
    %22 = vector.shape_cast %21 : vector<16xf32> to vector<16x1xf32>
    %23 = tpu.reciprocal %22 : vector<16x1xf32> -> vector<16x1xf32>
    %24 = vector.broadcast %23 : vector<16x1xf32> to vector<16x16xf32>
    %25 = arith.mulf %20, %24 : vector<16x16xf32>
    %c16 = arith.constant 16 : index
    %c0_11 = arith.constant 0 : index
    %26 = vector.load %arg2[%c16, %c0_11] : memref<48x128xf32, #tpu.memory_space<vmem>>, vector<16x16xf32>
    tpu.vector_store %arg2[%c16, %c0_11], %25 {strides = array<i32>} : memref<48x128xf32, #tpu.memory_space<vmem>>, vector<16x16xf32>,
    %cst_12 = arith.constant dense<0.000000e+00> : vector<16x16xf32>
    %27 = tpu.matmul %25, %13, %cst_12 {dimension_numbers = #tpu.dot_dimension_numbers<[1], [0], [0], [1], [0, 0, 1, 1], [], []>} : vector<16x16xf32>, vector<16x16xf32>, vector<16x16xf32> -> vector<16x16xf32>
    %c32 = arith.constant 32 : index
    %c0_13 = arith.constant 0 : index
    %28 = vector.load %arg1[%c32, %c0_13] : memref<104x128xf32, #tpu.memory_space<vmem>>, vector<16x32xf32>
    %cst_14 = arith.constant dense<0.000000e+00> : vector<16x32xf32>
    %29 = tpu.matmul %27, %28, %cst_14 {dimension_numbers = #tpu.dot_dimension_numbers<[1], [0], [0], [1], [0, 0, 1, 1], [], []>} : vector<16x16xf32>, vector<16x32xf32>, vector<16x32xf32> -> vector<16x32xf32>
    %30 = vector.extract_strided_slice %8 {offsets = [0, 16], sizes = [16, 16], strides = [1, 1]} : vector<16x96xf32> to vector<16x16xf32>
    %31 = vector.extract_strided_slice %8 {offsets = [0, 48], sizes = [16, 16], strides = [1, 1]} : vector<16x96xf32> to vector<16x16xf32>
    %32 = vector.extract_strided_slice %8 {offsets = [0, 80], sizes = [16, 16], strides = [1, 1]} : vector<16x96xf32> to vector<16x16xf32>
    %cst_15 = arith.constant dense<0.000000e+00> : vector<16x16xf32>
    %33 = tpu.matmul %30, %31, %cst_15 {dimension_numbers = #tpu.dot_dimension_numbers<[1], [1], [0], [0], [0, 0, 1, 0], [], []>} : vector<16x16xf32>, vector<16x16xf32>, vector<16x16xf32> -> vector<16x16xf32>
    %34 = arith.addf %33, %9 : vector<16x16xf32>
    %cst_16 = arith.constant dense<0xFF800000> : vector<16xf32>
    %35 = vector.multi_reduction <maximumf>, %34, %cst_16 [1] : vector<16x16xf32> to vector<16xf32>
    %36 = vector.shape_cast %35 : vector<16xf32> to vector<16x1xf32>
    %37 = vector.broadcast %36 : vector<16x1xf32> to vector<16x16xf32>
    %38 = arith.subf %34, %37 : vector<16x16xf32>
    %39 = math.exp %38 : vector<16x16xf32>
    %cst_17 = arith.constant dense<0.000000e+00> : vector<16xf32>
    %40 = vector.multi_reduction <add>, %39, %cst_17 [1] : vector<16x16xf32> to vector<16xf32>
    %41 = vector.shape_cast %40 : vector<16xf32> to vector<16x1xf32>
    %42 = tpu.reciprocal %41 : vector<16x1xf32> -> vector<16x1xf32>
    %43 = vector.broadcast %42 : vector<16x1xf32> to vector<16x16xf32>
    %44 = arith.mulf %39, %43 : vector<16x16xf32>
    %c32_18 = arith.constant 32 : index
    %c0_19 = arith.constant 0 : index
    %45 = vector.load %arg2[%c32_18, %c0_19] : memref<48x128xf32, #tpu.memory_space<vmem>>, vector<16x16xf32>
    tpu.vector_store %arg2[%c32_18, %c0_19], %44 {strides = array<i32>} : memref<48x128xf32, #tpu.memory_space<vmem>>, vector<16x16xf32>,
    %cst_20 = arith.constant dense<0.000000e+00> : vector<16x16xf32>
    %46 = tpu.matmul %44, %32, %cst_20 {dimension_numbers = #tpu.dot_dimension_numbers<[1], [0], [0], [1], [0, 0, 1, 1], [], []>} : vector<16x16xf32>, vector<16x16xf32>, vector<16x16xf32> -> vector<16x16xf32>
    %c48 = arith.constant 48 : index
    %c0_21 = arith.constant 0 : index
    %47 = vector.load %arg1[%c48, %c0_21] : memref<104x128xf32, #tpu.memory_space<vmem>>, vector<16x32xf32>
    %cst_22 = arith.constant dense<0.000000e+00> : vector<16x32xf32>
    %48 = tpu.matmul %46, %47, %cst_22 {dimension_numbers = #tpu.dot_dimension_numbers<[1], [0], [0], [1], [0, 0, 1, 1], [], []>} : vector<16x16xf32>, vector<16x32xf32>, vector<16x32xf32> -> vector<16x32xf32>
    %49 = arith.addf %29, %48 : vector<16x32xf32>
    %50 = vector.broadcast %10 : vector<1x32xf32> to vector<16x32xf32>
    %51 = arith.addf %49, %50 : vector<16x32xf32>
    %52 = arith.addf %2, %51 : vector<16x32xf32>
    %cst_23 = arith.constant dense<0.000000e+00> : vector<16xf32>
    %53 = vector.multi_reduction <add>, %52, %cst_23 [1] : vector<16x32xf32> to vector<16xf32>
    %54 = vector.shape_cast %53 : vector<16xf32> to vector<16x1xf32>
    %cst_24 = arith.constant 3.200000e+01 : f32
    %55 = vector.broadcast %cst_24 : f32 to vector<16x1xf32>
    %56 = arith.divf %54, %55 : vector<16x1xf32>
    %57 = vector.broadcast %56 : vector<16x1xf32> to vector<16x32xf32>
    %58 = arith.subf %52, %57 : vector<16x32xf32>
    %59 = arith.mulf %58, %58 : vector<16x32xf32>
    %cst_25 = arith.constant dense<0.000000e+00> : vector<16xf32>
    %60 = vector.multi_reduction <add>, %59, %cst_25 [1] : vector<16x32xf32> to vector<16xf32>
    %61 = vector.shape_cast %60 : vector<16xf32> to vector<16x1xf32>
    %cst_26 = arith.constant 3.200000e+01 : f32
    %62 = vector.broadcast %cst_26 : f32 to vector<16x1xf32>
    %63 = arith.divf %61, %62 : vector<16x1xf32>
    %64 = vector.broadcast %56 : vector<16x1xf32> to vector<16x32xf32>
    %65 = arith.subf %52, %64 : vector<16x32xf32>
    %cst_27 = arith.constant 9.99999974E-6 : f32
    %66 = vector.broadcast %cst_27 : f32 to vector<16x1xf32>
    %67 = arith.addf %63, %66 : vector<16x1xf32>
    %68 = math.rsqrt %67 : vector<16x1xf32>
    %69 = vector.broadcast %68 : vector<16x1xf32> to vector<16x32xf32>
    %70 = arith.mulf %65, %69 : vector<16x32xf32>
    %c0_28 = arith.constant 0 : index
    %c96_29 = arith.constant 96 : index
    %71 = vector.load %arg1[%c0_28, %c96_29] : memref<104x128xf32, #tpu.memory_space<vmem>>, vector<32x32xf32>
    %c97 = arith.constant 97 : index
    %c0_30 = arith.constant 0 : index
    %72 = vector.load %arg1[%c97, %c0_30] : memref<104x128xf32, #tpu.memory_space<vmem>>, vector<1x32xf32>
    %c32_31 = arith.constant 32 : index
    %c32_32 = arith.constant 32 : index
    %73 = vector.load %arg1[%c32_31, %c32_32] : memref<104x128xf32, #tpu.memory_space<vmem>>, vector<32x32xf32>
    %c97_33 = arith.constant 97 : index
    %c32_34 = arith.constant 32 : index
    %74 = vector.load %arg1[%c97_33, %c32_34] : memref<104x128xf32, #tpu.memory_space<vmem>>, vector<1x32xf32>
    %cst_35 = arith.constant dense<0.000000e+00> : vector<16x32xf32>
    %75 = tpu.matmul %70, %71, %cst_35 {dimension_numbers = #tpu.dot_dimension_numbers<[1], [0], [0], [1], [0, 0, 1, 1], [], []>} : vector<16x32xf32>, vector<32x32xf32>, vector<16x32xf32> -> vector<16x32xf32>
    %76 = vector.broadcast %72 : vector<1x32xf32> to vector<16x32xf32>
    %77 = arith.addf %75, %76 : vector<16x32xf32>
    %cst_36 = arith.constant 0.000000e+00 : f32
    %78 = vector.broadcast %cst_36 : f32 to vector<16x32xf32>
    %79 = arith.maximumf %77, %78 : vector<16x32xf32>
    %cst_37 = arith.constant dense<0.000000e+00> : vector<16x32xf32>
    %80 = tpu.matmul %79, %73, %cst_37 {dimension_numbers = #tpu.dot_dimension_numbers<[1], [0], [0], [1], [0, 0, 1, 1], [], []>} : vector<16x32xf32>, vector<32x32xf32>, vector<16x32xf32> -> vector<16x32xf32>
    %81 = vector.broadcast %74 : vector<1x32xf32> to vector<16x32xf32>
    %82 = arith.addf %80, %81 : vector<16x32xf32>
    %83 = arith.addf %70, %82 : vector<16x32xf32>
    %cst_38 = arith.constant dense<0.000000e+00> : vector<16xf32>
    %84 = vector.multi_reduction <add>, %83, %cst_38 [1] : vector<16x32xf32> to vector<16xf32>
    %85 = vector.shape_cast %84 : vector<16xf32> to vector<16x1xf32>
    %cst_39 = arith.constant 3.200000e+01 : f32
    %86 = vector.broadcast %cst_39 : f32 to vector<16x1xf32>
    %87 = arith.divf %85, %86 : vector<16x1xf32>
    %88 = vector.broadcast %87 : vector<16x1xf32> to vector<16x32xf32>
    %89 = arith.subf %83, %88 : vector<16x32xf32>
    %90 = arith.mulf %89, %89 : vector<16x32xf32>
    %cst_40 = arith.constant dense<0.000000e+00> : vector<16xf32>
    %91 = vector.multi_reduction <add>, %90, %cst_40 [1] : vector<16x32xf32> to vector<16xf32>
    %92 = vector.shape_cast %91 : vector<16xf32> to vector<16x1xf32>
    %cst_41 = arith.constant 3.200000e+01 : f32
    %93 = vector.broadcast %cst_41 : f32 to vector<16x1xf32>
    %94 = arith.divf %92, %93 : vector<16x1xf32>
    %95 = vector.broadcast %87 : vector<16x1xf32> to vector<16x32xf32>
    %96 = arith.subf %83, %95 : vector<16x32xf32>
    %cst_42 = arith.constant 9.99999974E-6 : f32
    %97 = vector.broadcast %cst_42 : f32 to vector<16x1xf32>
    %98 = arith.addf %94, %97 : vector<16x1xf32>
    %99 = math.rsqrt %98 : vector<16x1xf32>
    %100 = vector.broadcast %99 : vector<16x1xf32> to vector<16x32xf32>
    %101 = arith.mulf %96, %100 : vector<16x32xf32>
    %c64_43 = arith.constant 64 : index
    %c96_44 = arith.constant 96 : index
    %102 = vector.load %arg1[%c64_43, %c96_44] : memref<104x128xf32, #tpu.memory_space<vmem>>, vector<2x16xf32>
    %cst_45 = arith.constant dense<0.000000e+00> : vector<2x32xf32>
    %103 = tpu.matmul %102, %101, %cst_45 {dimension_numbers = #tpu.dot_dimension_numbers<[1], [0], [0], [1], [0, 0, 1, 1], [], []>} : vector<2x16xf32>, vector<16x32xf32>, vector<2x32xf32> -> vector<2x32xf32>
    %c32_46 = arith.constant 32 : index
    %c64_47 = arith.constant 64 : index
    %104 = vector.load %arg1[%c32_46, %c64_47] : memref<104x128xf32, #tpu.memory_space<vmem>>, vector<32x32xf32>
    %c97_48 = arith.constant 97 : index
    %c64_49 = arith.constant 64 : index
    %105 = vector.load %arg1[%c97_48, %c64_49] : memref<104x128xf32, #tpu.memory_space<vmem>>, vector<1x32xf32>
    %c64_50 = arith.constant 64 : index
    %c32_51 = arith.constant 32 : index
    %106 = vector.load %arg1[%c64_50, %c32_51] : memref<104x128xf32, #tpu.memory_space<vmem>>, vector<32x10xf32>
    %c98 = arith.constant 98 : index
    %c0_52 = arith.constant 0 : index
    %107 = vector.load %arg1[%c98, %c0_52] : memref<104x128xf32, #tpu.memory_space<vmem>>, vector<1x10xf32>
    %cst_53 = arith.constant dense<0.000000e+00> : vector<2x32xf32>
    %108 = tpu.matmul %103, %104, %cst_53 {dimension_numbers = #tpu.dot_dimension_numbers<[1], [0], [0], [1], [0, 0, 1, 1], [], []>} : vector<2x32xf32>, vector<32x32xf32>, vector<2x32xf32> -> vector<2x32xf32>
    %109 = vector.broadcast %105 : vector<1x32xf32> to vector<2x32xf32>
    %110 = arith.addf %108, %109 : vector<2x32xf32>
    %cst_54 = arith.constant 0.000000e+00 : f32
    %111 = vector.broadcast %cst_54 : f32 to vector<2x32xf32>
    %112 = arith.maximumf %110, %111 : vector<2x32xf32>
    %cst_55 = arith.constant dense<0.000000e+00> : vector<2x10xf32>
    %113 = tpu.matmul %112, %106, %cst_55 {dimension_numbers = #tpu.dot_dimension_numbers<[1], [0], [0], [1], [0, 0, 1, 1], [], []>} : vector<2x32xf32>, vector<32x10xf32>, vector<2x10xf32> -> vector<2x10xf32>
    %114 = vector.broadcast %107 : vector<1x10xf32> to vector<2x10xf32>
    %115 = arith.addf %113, %114 : vector<2x10xf32>
    %c0_56 = arith.constant 0 : index
    %c0_57 = arith.constant 0 : index
    %116 = vector.load %arg2[%c0_56, %c0_57] : memref<48x128xf32, #tpu.memory_space<vmem>>, vector<2x10xf32>
    tpu.vector_store %arg2[%c0_56, %c0_57], %115 {strides = array<i32>} : memref<48x128xf32, #tpu.memory_space<vmem>>, vector<2x10xf32>,
    %c32_58 = arith.constant 32 : index
    %c96_59 = arith.constant 96 : index
    %117 = vector.load %arg1[%c32_58, %c96_59] : memref<104x128xf32, #tpu.memory_space<vmem>>, vector<32x32xf32>
    %c64_60 = arith.constant 64 : index
    %c0_61 = arith.constant 0 : index
    %118 = vector.load %arg1[%c64_60, %c0_61] : memref<104x128xf32, #tpu.memory_space<vmem>>, vector<16x32xf32>
    %c97_62 = arith.constant 97 : index
    %c96_63 = arith.constant 96 : index
    %119 = vector.load %arg1[%c97_62, %c96_63] : memref<104x128xf32, #tpu.memory_space<vmem>>, vector<1x32xf32>
    %cst_64 = arith.constant dense<0.000000e+00> : vector<16x32xf32>
    %120 = tpu.matmul %101, %117, %cst_64 {dimension_numbers = #tpu.dot_dimension_numbers<[1], [0], [0], [1], [0, 0, 1, 1], [], []>} : vector<16x32xf32>, vector<32x32xf32>, vector<16x32xf32> -> vector<16x32xf32>
    %cst_65 = arith.constant dense<0.000000e+00> : vector<16x32xf32>
    %121 = tpu.matmul %3, %118, %cst_65 {dimension_numbers = #tpu.dot_dimension_numbers<[1], [0], [0], [1], [0, 0, 1, 1], [], []>} : vector<16x16xf32>, vector<16x32xf32>, vector<16x32xf32> -> vector<16x32xf32>
    %122 = arith.addf %120, %121 : vector<16x32xf32>
    %123 = vector.broadcast %119 : vector<1x32xf32> to vector<16x32xf32>
    %124 = arith.addf %122, %123 : vector<16x32xf32>
    %cst_66 = arith.constant 0.000000e+00 : f32
    %125 = vector.broadcast %cst_66 : f32 to vector<16x32xf32>
    %126 = arith.maximumf %124, %125 : vector<16x32xf32>
    %cst_67 = arith.constant dense<0.000000e+00> : vector<2x32xf32>
    %127 = tpu.matmul %102, %126, %cst_67 {dimension_numbers = #tpu.dot_dimension_numbers<[1], [0], [0], [1], [0, 0, 1, 1], [], []>} : vector<2x16xf32>, vector<16x32xf32>, vector<2x32xf32> -> vector<2x32xf32>
    %c64_68 = arith.constant 64 : index
    %c48_69 = arith.constant 48 : index
    %128 = vector.load %arg1[%c64_68, %c48_69] : memref<104x128xf32, #tpu.memory_space<vmem>>, vector<32x1xf32>
    %c98_70 = arith.constant 98 : index
    %c16_71 = arith.constant 16 : index
    %129 = vector.load %arg1[%c98_70, %c16_71] : memref<104x128xf32, #tpu.memory_space<vmem>>, vector<1x1xf32>
    %cst_72 = arith.constant dense<0.000000e+00> : vector<2x1xf32>
    %130 = tpu.matmul %127, %128, %cst_72 {dimension_numbers = #tpu.dot_dimension_numbers<[1], [0], [0], [1], [0, 0, 1, 1], [], []>} : vector<2x32xf32>, vector<32x1xf32>, vector<2x1xf32> -> vector<2x1xf32>
    %131 = vector.broadcast %129 : vector<1x1xf32> to vector<2x1xf32>
    %132 = arith.addf %130, %131 : vector<2x1xf32>
    %c8 = arith.constant 8 : index
    %c0_73 = arith.constant 0 : index
    %133 = vector.load %arg2[%c8, %c0_73] : memref<48x128xf32, #tpu.memory_space<vmem>>, vector<2x1xf32>
    tpu.vector_store %arg2[%c8, %c0_73], %132 {strides = array<i32>} : memref<48x128xf32, #tpu.memory_space<vmem>>, vector<2x1xf32>,
    return
  }
}

</mosaic_0001>

<bundles_post_ra>
// kernel: transformer_nr_forward.1
= control target key start
LH: loop header
LB: loop body
LE: loop exit
PB: predicated region body
PF: predicated region fallthrough
CT: control target
= control target key end

     0   :  { %vm26_vm0 = vcmask 261120   ;;  %vm124_vm1 = vcmask 130048   ;;  %s1886_s26 = smov 80   ;;  %s1887_s27 = smov 96   ;;  %vm1893_vm2 = vmmov 0   ;;  %vm1224_vm3 = vcmask 74752   ;;  %s2224_s1 = inlined_call_operand.vmem [shape: f32[104,128], index: 1, kind: input, shape index: {}]   ;;  %s2225_s0 = inlined_call_operand.vmem [shape: f32[16,32], index: 0, kind: input, shape index: {}]   ;;  %s2226_s2 = inlined_call_operand.vmem [shape: f32[48,128], index: 2, kind: output, shape index: {}]  }
   0x1   :  { %v1912_v0 = vld [vmem:[%s2224_s1 + $0x18] sm:$0xff]  ;;  %v1917_v1 = vld [vmem:[%s2224_s1 + $0x10] sm:$0xff]  ;;  %v1923_v2 = vld [vmem:[%s2224_s1 + $0x8] sm:$0xff]  ;;  %s1888_s28 = smov 112   ;;  %s1889_s5 = smov 64   ;;  %vm1599_vm4 = vcmask 1024  }
   0x2   :  { %1714 = vmatprep.subr.mxu0 %v1912_v0  ;;  %v1928_v3 = vld [vmem:[%s2225_s0] sm:$0xff]  ;;  %v1934_v4 = vld [vmem:[%s2225_s0 + $0x8] sm:$0xff]  ;;  %v1939_v5 = vld [vmem:[%s2224_s1 + $0x50] sm:$0xff]  ;;  %s1890_s6 = smov 48   ;;  %s1891_s0 = smov 32  }
   0x3   :  { %1715 = vmatpush3.msra.mxu0 %v1912_v0  ;;  %v1944_v6 = vld [vmem:[%s2224_s1 + $0x58] sm:$0xff]  ;;  %v1949_v7 = vadd.f32 %v1939_v5, %v1928_v3  ;;  %v1955_v8 = vld [vmem:[%s2224_s1] sm:$0xff]  ;;  %v1997_v15 = vld [vmem:[%s2224_s1 + $0x48] sm:$0xff] }
   0x4   :  { %1716 = vmatprep.subr.mxu0 %v1917_v1  ;;  %v1960_v9 = vadd.f32 %v1944_v6, %v1934_v4  ;;  %v1972_v10 = vld [vmem:[%s2224_s1 + $0x60] ss:$0 sm:$0xff] }
   0x5   :  { %1717 = vmatpush3.msra.mxu0 %v1917_v1  ;;  %1722 = vmatprep.mubr.msk.f32.mxu0 %vm26_vm0, %v1949_v7  ;;  %v2002_v16 = vld [vmem:[%s2224_s1 + $0x40] sm:$0xff] }
   0x6   :  { %1718 = vmatprep.subr.mxu0 %v1923_v2 }
   0x7   :  { %1719 = vmatpush3.msra.mxu0 %v1923_v2 }
   0x8   :  { %1720 = vmatprep.subr.mxu0 %v1955_v8 }
   0x9   :  { %1721 = vmatpush3.msra.mxu0 %v1955_v8 }
   0xa   :  { %1723 = vmatmul.mubr.msk.f32.vlgmr.msra.gmra.mxu0 %vm26_vm0, %v1960_v9 }
  0xca   :  { %v1724_v11 = vpop.f32.mrf.mxu0 }
  0xcb   :  { %v1975_v12 = vadd.f32 %v1724_v11, %v1972_v10 }
  0xcc   :  { %v99_v13 = vpop.f32.mrf.mxu0 }
  0xcd   :  { %v1978_v14 = vadd.f32 %v1972_v10, %v99_v13  ;;  %327 = vrot.lane.b32.xlu1 %v1975_v12, %s1886_s26  ;;  %114 = vrot.lane.b32.xlu0 %v1975_v12, %s1887_s27 }
  0xcf   :  { %1729 = vmatprep.mubr.msk.f32.mxu1 %vm124_vm1, %v1978_v14 }
  0xd1   :  { %325 = vrot.lane.b32.xlu1 %v1978_v14, %s1886_s26  ;;  %112 = vrot.lane.b32.xlu0 %v1978_v14, %s1887_s27 }
  0xd5   :  { %323 = vrot.lane.b32.xlu1 %v1975_v12, %s1888_s28  ;;  %321 = vrot.lane.b32.xlu0 %v1978_v14, %s1888_s28 }
  0xd9   :  { %120 = vrot.lane.b32.xlu1 %v1997_v15, %s1889_s5  ;;  %118 = vrot.lane.b32.xlu0 %v2002_v16, %s1889_s5 }
 0x13f   :  { %v115_v17 = vpop.permute.xlu0 %114  ;;  %v328_v18 = vpop.permute.xlu1 %327 }
 0x140   :  { %1725 = vmatprep.subr.msk.mxu1 %vm124_vm1, %v115_v17 }
 0x141   :  { %1726 = vmatpush3.xpose.msk.msra.mxu1 %vm124_vm1, %v115_v17 }
 0x143   :  { %v113_v19 = vpop.permute.xlu0 %112  ;;  %v326_v21 = vpop.permute.xlu1 %325 }
 0x144   :  { %1727 = vmatprep.subr.msk.mxu1 %vm124_vm1, %v113_v19 }
 0x145   :  { %1728 = vmatpush3.xpose.msk.msra.mxu1 %vm124_vm1, %v113_v19 }
 0x146   :  { %1739 = vmatprep.subr.msk.mxu1 %vm124_vm1, %v328_v18 }
 0x147   :  { %v322_v20 = vpop.permute.xlu0 %321  ;;  %v324_v22 = vpop.permute.xlu1 %323 }
 0x148   :  { %1730 = vmatmul.mubr.msk.f32.vlgmr.msra.gmra.mxu1 %vm124_vm1, %v1975_v12 }
 0x149   :  { %1740 = vmatpush3.xpose.msk.msra.mxu1 %vm124_vm1, %v328_v18  ;;  %1743 = vmatprep.mubr.msk.f32.mxu1 %vm124_vm1, %v322_v20 }
 0x14a   :  { %1741 = vmatprep.subr.msk.mxu1 %vm124_vm1, %v326_v21 }
 0x14b   :  { %v121_v23 = vpop.permute.xlu1 %120  ;;  %v119_v25 = vpop.permute.xlu0 %118 }
 0x14d   :  { %1742 = vmatpush3.xpose.msk.msra.mxu1 %vm124_vm1, %v326_v21 }
 0x150   :  { %1744 = vmatmul.mubr.msk.f32.vlgmr.msra.gmra.mxu1 %vm124_vm1, %v324_v22  ;;  %v2057_v22 = vld [vmem:[%s2224_s1 + $0x28] sm:$0xff] }
 0x151   :  { %1760 = vmatprep.subr.mxu1 %v2057_v22 }
 0x152   :  { %1761 = vmatpush3.msra.mxu1 %v2057_v22 }
 0x208   :  { %v1731_v24 = vpop.f32.mrf.mxu1 }
 0x209   :  { %v205_v26 = vadd.f32 %v1731_v24, %v121_v23  ;;  %v2071_v24 = vld [vmem:[%s2224_s1 + $0x38] sm:$0xff] }
 0x20a   :  { %v199_v27 = vpop.f32.mrf.mxu1 }
 0x20b   :  { %v200_v28 = vadd.f32 %v199_v27, %v119_v25  ;;  %v211_v29 = vsel %vm124_vm1, %v205_v26, -inf }
 0x20c   :  { %212 = vmax.xlane.f32.xlu1 %v211_v29 }
 0x20d   :  { %v208_v30 = vsel %vm124_vm1, %v200_v28, -inf }
 0x20e   :  { %209 = vmax.xlane.f32.xlu0 %v208_v30 }
 0x210   :  { %v1745_v31 = vpop.f32.mrf.mxu1 }
 0x211   :  { %v409_v34 = vadd.f32 %v1745_v31, %v121_v23  ;;  %v2064_v23 = vld [vmem:[%s2224_s1 + $0x20] sm:$0xff] }
 0x212   :  { %v403_v32 = vpop.f32.mrf.mxu1  ;;  %1762 = vmatprep.subr.mxu1 %v2064_v23 }
 0x213   :  { %v404_v33 = vadd.f32 %v403_v32, %v119_v25  ;;  %v415_v36 = vsel %vm124_vm1, %v409_v34, -inf  ;;  %1763 = vmatpush3.msra.mxu1 %v2064_v23  ;;  %v2078_v25 = vld [vmem:[%s2224_s1 + $0x30] sm:$0xff] }
 0x215   :  { %v412_v35 = vsel %vm124_vm1, %v404_v33, -inf }
 0x216   :  { %413 = vmax.xlane.f32.xlu0 %v412_v35 }
 0x21a   :  { %416 = vmax.xlane.f32.xlu0 %v415_v36 }
 0x21d   :  { %234 = vrot.lane.b32.xlu1 %v1975_v12, %s1889_s5 }
 0x295   :  { %v213_v37 = vpop.xlane.xlu1 %212 }
 0x296   :  { %v215_v38 = vsub.f32 %v205_v26, %v213_v37 }
 0x297   :  { %v210_v39 = vpop.xlane.xlu0 %209 }
 0x298   :  { %v218_v40 = vmul.f32 1.442695, %v215_v38  ;;  %v214_v41 = vsub.f32 %v200_v28, %v210_v39 }
 0x299   :  { %v235_v42 = vpop.permute.xlu1 %234 }
 0x29a   :  { %1862 = vpow2.f32 %v218_v40  ;;  %v216_v43 = vmul.f32 1.442695, %v214_v41  ;;  %1732 = vmatprep.subr.mxu0 %v235_v42 }
 0x29b   :  { %1733 = vmatpush3.msra.mxu0 %v235_v42 }
 0x29c   :  { %1864 = vpow2.f32 %v216_v43 }
 0x29f   :  { %v414_v44 = vpop.xlane.xlu0 %413 }
 0x2a0   :  { %v418_v54 = vsub.f32 %v404_v33, %v414_v44 }
 0x2a2   :  { %v420_v55 = vmul.f32 1.442695, %v418_v54 }
 0x2a3   :  { %v417_v45 = vpop.xlane.xlu0 %416 }
 0x2a4   :  { %v419_v46 = vsub.f32 %v409_v34, %v417_v45 }
 0x2a6   :  { %v422_v47 = vmul.f32 1.442695, %v419_v46 }
 0x2a7   :  { %v1863_v48 = vpop.eup %1862 }
 0x2a8   :  { %1866 = vpow2.f32 %v422_v47  ;;  %v223_v49 = vsel %vm124_vm1, %v1863_v48, 0.0 }
 0x2a9   :  { %v1865_v50 = vpop.eup %1864  ;;  %224 = vadd.xlane.f32.xlu0 %v223_v49  ;;  %1868 = vpow2.f32 %v420_v55 }
 0x2aa   :  { %v220_v51 = vsel %vm124_vm1, %v1865_v50, 0.0 }
 0x2ab   :  { %221 = vadd.xlane.f32.xlu1 %v220_v51 }
 0x2b5   :  { %v1867_v52 = vpop.eup %1866 }
 0x2b6   :  { %v427_v53 = vsel %vm124_vm1, %v1867_v52, 0.0  ;;  %v1869_v56 = vpop.eup %1868 }
 0x2b7   :  { %428 = vadd.xlane.f32.xlu0 %v427_v53  ;;  %v424_v57 = vsel %vm124_vm1, %v1869_v56, 0.0 }
 0x2bc   :  { %438 = vrot.lane.b32.xlu1 %v1975_v12, %s1890_s6 }
 0x2cd   :  { %232 = vrot.lane.b32.xlu0 %v1978_v14, %s1889_s5 }
 0x2d1   :  { %688 = vrot.lane.b32.xlu0 %v1972_v10, %s1891_s0 }
 0x2e0   :  { %425 = vadd.xlane.f32.xlu1 %v424_v57 }
 0x2f1   :  { %436 = vrot.lane.b32.xlu1 %v1978_v14, %s1890_s6 }
 0x332   :  { %v225_v58 = vpop.xlane.xlu0 %224 }
 0x333   :  { %1870 = vrcp.f32 %v225_v58 }
 0x334   :  { %v222_v59 = vpop.xlane.xlu1 %221 }
 0x335   :  { %1872 = vrcp.f32 %v222_v59 }
 0x338   :  { %v439_v13 = vpop.permute.xlu1 %438 }
 0x340   :  { %v1871_v60 = vpop.eup %1870  ;;  %v429_v61 = vpop.xlane.xlu0 %428 }
 0x341   :  { %1874 = vrcp.f32 %v429_v61  ;;  %v229_v62 = vmul.f32 %v1871_v60, %v1863_v48 }
 0x342   :  { %v1873_v63 = vpop.eup %1872 }
 0x343   :  { %v228_v11 = vmul.f32 %v1873_v63, %v1865_v50  ;;  %231 = vst.msk [vmem:[%s2226_s2 + $0x18] sm:$0xff] %vm124_vm1, %v229_v62 }
 0x344   :  { %v233_v12 = vpop.permute.xlu0 %232 }
 0x345   :  { %1734 = vmatprep.subr.mxu0 %v233_v12  ;;  %230 = vst.msk [vmem:[%s2226_s2 + $0x10] sm:$0xff] %vm124_vm1, %v228_v11  ;;  %1736 = vmatprep.mubr.msk.f32.mxu0 %vm124_vm1, %v228_v11 }
 0x346   :  { %1735 = vmatpush3.msra.mxu0 %v233_v12 }
 0x347   :  { %1737 = vmatmul.mubr.msk.f32.vlgmr.msra.gmra.mxu0 %vm124_vm1, %v229_v62  ;;  %1746 = vmatprep.subr.mxu0 %v439_v13  ;;  %v2115_v62 = vld [vmem:[%s2224_s1 + $0x61] ss:$0 sm:$0xff] }
 0x348   :  { %1747 = vmatpush3.msra.mxu0 %v439_v13  ;;  %v689_v32 = vpop.permute.xlu0 %688 }
 0x34e   :  { %v1875_v14 = vpop.eup %1874 }
 0x34f   :  { %v433_v17 = vmul.f32 %v1875_v14, %v1867_v52 }
 0x351   :  { %435 = vst.msk [vmem:[%s2226_s2 + $0x28] sm:$0xff] %vm124_vm1, %v433_v17 }
 0x369   :  { %v426_v18 = vpop.xlane.xlu1 %425 }
 0x36a   :  { %1876 = vrcp.f32 %v426_v18 }
 0x36d   :  { %v437_v19 = vpop.permute.xlu1 %436 }
 0x36e   :  { %1748 = vmatprep.subr.mxu0 %v437_v19 }
 0x36f   :  { %1749 = vmatpush3.msra.mxu0 %v437_v19 }
 0x370   :  { %1753 = vmatprep.subr.mxu0 %v2071_v24 }
 0x377   :  { %v1877_v20 = vpop.eup %1876 }
 0x378   :  { %v432_v21 = vmul.f32 %v1877_v20, %v1869_v56 }
 0x37a   :  { %434 = vst.msk [vmem:[%s2226_s2 + $0x20] sm:$0xff] %vm124_vm1, %v432_v21  ;;  %1750 = vmatprep.mubr.msk.f32.mxu0 %vm124_vm1, %v432_v21 }
 0x37b   :  { %1751 = vmatmul.mubr.msk.f32.vlgmr.msra.gmra.mxu0 %vm124_vm1, %v433_v17 }
 0x37c   :  { %1754 = vmatpush3.msra.mxu0 %v2071_v24 }
 0x37d   :  { %1755 = vmatprep.subr.mxu0 %v2078_v25 }
 0x37e   :  { %1756 = vmatpush3.msra.mxu0 %v2078_v25 }
 0x407   :  { %v1738_v26 = vpop.f32.mrf.mxu0 }
 0x409   :  { %v310_v27 = vpop.f32.mrf.mxu0 }
 0x40a   :  { %1764 = vmatprep.mubr.msk.f32.mxu1 %vm124_vm1, %v310_v27 }
 0x40b   :  { %1765 = vmatmul.mubr.msk.f32.vlgmr.msra.gmra.mxu1 %vm124_vm1, %v1738_v26 }
 0x43b   :  { %v1752_v28 = vpop.f32.mrf.mxu0 }
 0x43d   :  { %v514_v29 = vpop.f32.mrf.mxu0 }
 0x43e   :  { %1757 = vmatprep.mubr.msk.f32.mxu0 %vm124_vm1, %v514_v29 }
 0x43f   :  { %1758 = vmatmul.mubr.msk.f32.vlgmr.msra.gmra.mxu0 %vm124_vm1, %v1752_v28 }
 0x4cb   :  { %v1766_v30 = vpop.f32.mrf.mxu1 }
 0x4cd   :  { %v678_v34 = vpop.f32.mrf.mxu1 }
 0x4ff   :  { %v1759_v31 = vpop.f32.mrf.mxu0 }
 0x500   :  { %v684_v33 = vadd.f32 %v1766_v30, %v1759_v31 }
 0x501   :  { %v597_v35 = vpop.f32.mrf.mxu0 }
 0x502   :  { %v679_v36 = vadd.f32 %v678_v34, %v597_v35  ;;  %v692_v10 = vadd.f32 %v689_v32, %v684_v33  ;;  %v961_v33 = vld [vmem:[%s2224_s1 + $0x40] sm:$0x3] }
 0x504   :  { %v691_v37 = vadd.f32 %v689_v32, %v679_v36  ;;  %v694_v38 = vadd.f32 %v692_v10, %v1960_v9 }
 0x506   :  { %v698_v39 = vsel %vm26_vm0, %v694_v38, 0.0  ;;  %v693_v40 = vadd.f32 %v691_v37, %v1949_v7 }
 0x507   :  { %699 = vadd.xlane.f32.xlu0 %v698_v39 }
 0x508   :  { %v695_v41 = vsel %vm26_vm0, %v693_v40, 0.0 }
 0x509   :  { %696 = vadd.xlane.f32.xlu1 %v695_v41 }
 0x51a   :  { %741 = vrot.lane.b32.xlu1 %v1917_v1, %s1891_s0 }
 0x51d   :  { %743 = vrot.lane.b32.xlu0 %v1912_v0, %s1891_s0 }
 0x590   :  { %v700_v42 = vpop.xlane.xlu0 %699 }
 0x591   :  { %v703_v43 = vmul.f32 0.03125, %v700_v42 }
 0x592   :  { %v697_v44 = vpop.xlane.xlu1 %696 }
 0x593   :  { %v705_v45 = vsub.f32 %v694_v38, %v703_v43  ;;  %v702_v46 = vmul.f32 0.03125, %v697_v44 }
 0x594   :  { %v744_v9 = vpop.permute.xlu0 %743 }
 0x595   :  { %v704_v47 = vsub.f32 %v693_v40, %v702_v46  ;;  %v707_v48 = vmul.f32 %v705_v45, %v705_v45  ;;  %1767 = vmatprep.subr.mxu0 %v744_v9 }
 0x596   :  { %1768 = vmatpush3.msra.mxu0 %v744_v9  ;;  %v742_v7 = vpop.permute.xlu1 %741 }
 0x597   :  { %v711_v49 = vsel %vm26_vm0, %v707_v48, 0.0  ;;  %v706_v50 = vmul.f32 %v704_v47, %v704_v47  ;;  %1769 = vmatprep.subr.mxu0 %v742_v7 }
 0x598   :  { %712 = vadd.xlane.f32.xlu1 %v711_v49  ;;  %1770 = vmatpush3.msra.mxu0 %v742_v7 }
 0x599   :  { %v708_v1 = vsel %vm26_vm0, %v706_v50, 0.0 }
 0x59a   :  { %709 = vadd.xlane.f32.xlu0 %v708_v1 }
 0x5a9   :  { %739 = vrot.lane.b32.xlu1 %v1923_v2, %s1891_s0 }
 0x5ad   :  { %842 = vrot.lane.b32.xlu1 %v2071_v24, %s1887_s27 }
 0x5b0   :  { %737 = vrot.lane.b32.xlu0 %v1955_v8, %s1891_s0 }
 0x5b1   :  { %838 = vrot.lane.b32.xlu1 %v2057_v22, %s1887_s27 }
 0x5b4   :  { %840 = vrot.lane.b32.xlu0 %v2078_v25, %s1887_s27 }
 0x5b5   :  { %849 = vrot.lane.b32.xlu1 %v2115_v62, %s1887_s27 }
 0x5b8   :  { %836 = vrot.lane.b32.xlu0 %v2064_v23, %s1887_s27 }
 0x621   :  { %v713_v0 = vpop.xlane.xlu1 %712 }
 0x622   :  { %v715_v51 = vmul.f32 0.03125, %v713_v0 }
 0x623   :  { %v710_v52 = vpop.xlane.xlu0 %709 }
 0x624   :  { %v717_v53 = vadd.f32 1e-05, %v715_v51  ;;  %v714_v2 = vmul.f32 0.03125, %v710_v52 }
 0x625   :  { %v740_v54 = vpop.permute.xlu1 %739 }
 0x626   :  { %v716_v55 = vadd.f32 1e-05, %v714_v2  ;;  %1771 = vmatprep.subr.mxu0 %v740_v54  ;;  %1878 = vrsqrt.f32 %v717_v53 }
 0x627   :  { %v738_v56 = vpop.permute.xlu0 %737  ;;  %1772 = vmatpush3.msra.mxu0 %v740_v54 }
 0x628   :  { %1880 = vrsqrt.f32 %v716_v55  ;;  %1773 = vmatprep.subr.mxu0 %v738_v56 }
 0x629   :  { %1774 = vmatpush3.msra.mxu0 %v738_v56  ;;  %v843_v8 = vpop.permute.xlu1 %842 }
 0x62a   :  { %1778 = vmatprep.subr.mxu1 %v843_v8 }
 0x62b   :  { %v841_v57 = vpop.permute.xlu0 %840  ;;  %1779 = vmatpush3.msra.mxu1 %v843_v8 }
 0x62c   :  { %1780 = vmatprep.subr.mxu1 %v841_v57 }
 0x62d   :  { %1781 = vmatpush3.msra.mxu1 %v841_v57  ;;  %v839_v63 = vpop.permute.xlu1 %838 }
 0x62e   :  { %1782 = vmatprep.subr.mxu1 %v839_v63 }
 0x62f   :  { %v837_v11 = vpop.permute.xlu0 %836  ;;  %1783 = vmatpush3.msra.mxu1 %v839_v63 }
 0x630   :  { %1784 = vmatprep.subr.mxu1 %v837_v11 }
 0x631   :  { %1785 = vmatpush3.msra.mxu1 %v837_v11  ;;  %v850_v20 = vpop.permute.xlu1 %849 }
 0x633   :  { %v1879_v58 = vpop.eup %1878 }
 0x634   :  { %v721_v61 = vmul.f32 %v1879_v58, %v705_v45 }
 0x635   :  { %v1881_v59 = vpop.eup %1880 }
 0x636   :  { %v720_v60 = vmul.f32 %v1881_v59, %v704_v47 }
 0x638   :  { %1775 = vmatprep.mubr.msk.f32.mxu0 %vm26_vm0, %v720_v60 }
 0x639   :  { %1776 = vmatmul.mubr.msk.f32.vlgmr.msra.gmra.mxu0 %vm26_vm0, %v721_v61 }
 0x6f9   :  { %v1777_v12 = vpop.f32.mrf.mxu0 }
 0x6fa   :  { %v827_v13 = vadd.f32 %v1777_v12, %v2115_v62 }
 0x6fb   :  { %v821_v14 = vpop.f32.mrf.mxu0 }
 0x6fc   :  { %v822_v17 = vadd.f32 %v2115_v62, %v821_v14  ;;  %v831_v19 = vmax.f32 %v827_v13, 0.0 }
 0x6fe   :  { %v830_v18 = vmax.f32 %v822_v17, 0.0 }
 0x700   :  { %1786 = vmatprep.mubr.msk.f32.mxu1 %vm26_vm0, %v830_v18 }
 0x701   :  { %1787 = vmatmul.mubr.msk.f32.vlgmr.msra.gmra.mxu1 %vm26_vm0, %v831_v19 }
 0x7c1   :  { %v1788_v21 = vpop.f32.mrf.mxu1 }
 0x7c2   :  { %v930_v26 = vadd.f32 %v1788_v21, %v850_v20 }
 0x7c3   :  { %v924_v27 = vpop.f32.mrf.mxu1 }
 0x7c4   :  { %v925_v28 = vadd.f32 %v924_v27, %v850_v20  ;;  %v934_v29 = vadd.f32 %v930_v26, %v721_v61 }
 0x7c6   :  { %v938_v30 = vsel %vm26_vm0, %v934_v29, 0.0  ;;  %v933_v31 = vadd.f32 %v925_v28, %v720_v60 }
 0x7c7   :  { %939 = vadd.xlane.f32.xlu0 %v938_v30 }
 0x7c8   :  { %v935_v32 = vsel %vm26_vm0, %v933_v31, 0.0 }
 0x7c9   :  { %936 = vadd.xlane.f32.xlu1 %v935_v32 }
 0x7da   :  { %963 = vrot.lane.b32.xlu1 %v961_v33, %s1891_s0 }
 0x7de   :  { %1046 = vrot.lane.b32.xlu1 %v2078_v25, %s1889_s5 }
 0x7e2   :  { %1044 = vrot.lane.b32.xlu1 %v2057_v22, %s1889_s5 }
 0x7e6   :  { %1145 = vrot.lane.b32.xlu1 %v1944_v6, %s1887_s27 }
 0x7ea   :  { %1054 = vrot.lane.b32.xlu1 %v2115_v62, %s1889_s5 }
 0x7ee   :  { %1139 = vrot.lane.b32.xlu1 %v2002_v16, %s1887_s27 }
 0x7f2   :  { %1326 = vrot.lane.b32.xlu1 %v2078_v25, %s1891_s0 }
 0x7f6   :  { %1322 = vrot.lane.b32.xlu1 %v2064_v23, %s1891_s0 }
 0x7fa   :  { %1237 = vrot.lane.b32.xlu1 %v1934_v4, %s1888_s28  ;;  %v1892_v4 = vmov 0.0  }
 0x7fb   :  { %1789 = vmatprep.subr.mxu0 %v1892_v4  ;;  %1796 = vmatprep.subr.mxu1 %v1892_v4 }
 0x7fc   :  { %1793 = vmatprep.mubr.msk.f32.mxu0 %vm1893_vm2, %v1892_v4  ;;  %1804 = vmatprep.mubr.msk.f32.mxu1 %vm1893_vm2, %v1892_v4 }
 0x7fe   :  { %1516 = vrot.lane.b32.xlu1 %v1944_v6, %s1886_s26 }
 0x802   :  { %1512 = vrot.lane.b32.xlu1 %v1997_v15, %s1886_s26 }
 0x850   :  { %v940_v34 = vpop.xlane.xlu0 %939 }
 0x851   :  { %v942_v35 = vmul.f32 0.03125, %v940_v34 }
 0x852   :  { %v937_v36 = vpop.xlane.xlu1 %936 }
 0x853   :  { %v944_v10 = vsub.f32 %v934_v29, %v942_v35  ;;  %v941_v37 = vmul.f32 0.03125, %v937_v36 }
 0x855   :  { %v943_v38 = vsub.f32 %v933_v31, %v941_v37  ;;  %v946_v39 = vmul.f32 %v944_v10, %v944_v10 }
 0x857   :  { %v950_v25 = vsel %vm26_vm0, %v946_v39, 0.0  ;;  %v945_v40 = vmul.f32 %v943_v38, %v943_v38 }
 0x858   :  { %951 = vadd.xlane.f32.xlu0 %v950_v25 }
 0x859   :  { %v947_v41 = vsel %vm26_vm0, %v945_v40, 0.0 }
 0x85c   :  { %948 = vadd.xlane.f32.xlu0 %v947_v41 }
 0x872   :  { %1048 = vrot.lane.b32.xlu0 %v2071_v24, %s1889_s5 }
 0x876   :  { %1042 = vrot.lane.b32.xlu0 %v2064_v23, %s1889_s5  ;;  %v2177_v23 = vpop.permute.xlu1 %963 }
 0x87a   :  { %1143 = vrot.lane.b32.xlu0 %v1939_v5, %s1887_s27  ;;  %v1047_v44 = vpop.permute.xlu1 %1046 }
 0x87e   :  { %1141 = vrot.lane.b32.xlu0 %v1997_v15, %s1887_s27  ;;  %v1045_v46 = vpop.permute.xlu1 %1044 }
 0x882   :  { %1328 = vrot.lane.b32.xlu0 %v2071_v24, %s1891_s0  ;;  %v1146_v49 = vpop.permute.xlu1 %1145 }
 0x886   :  { %1324 = vrot.lane.b32.xlu0 %v2057_v22, %s1891_s0  ;;  %v1055_v1 = vpop.permute.xlu1 %1054 }
 0x88a   :  { %1235 = vrot.lane.b32.xlu0 %v1928_v3, %s1888_s28  ;;  %v1140_v51 = vpop.permute.xlu1 %1139 }
 0x88e   :  { %1420 = vrot.lane.b32.xlu0 %v2115_v62, %s1891_s0  ;;  %v1327_v54 = vpop.permute.xlu1 %1326 }
 0x892   :  { %1514 = vrot.lane.b32.xlu0 %v1939_v5, %s1886_s26  ;;  %v1323_v56 = vpop.permute.xlu1 %1322 }
 0x896   :  { %1510 = vrot.lane.b32.xlu0 %v2002_v16, %s1886_s26  ;;  %v1238_v57 = vpop.permute.xlu1 %1237 }
 0x89a   :  { %v1517_v27 = vpop.permute.xlu1 %1516 }
 0x89e   :  { %v1513_v30 = vpop.permute.xlu1 %1512 }
 0x8e1   :  { %v952_v6 = vpop.xlane.xlu0 %951 }
 0x8e2   :  { %v954_v42 = vmul.f32 0.03125, %v952_v6 }
 0x8e4   :  { %v956_v24 = vadd.f32 1e-05, %v954_v42 }
 0x8e5   :  { %v949_v43 = vpop.xlane.xlu0 %948 }
 0x8e6   :  { %1882 = vrsqrt.f32 %v956_v24  ;;  %v953_v22 = vmul.f32 0.03125, %v949_v43 }
 0x8e8   :  { %v955_v45 = vadd.f32 1e-05, %v953_v22 }
 0x8e9   :  { %v1049_v3 = vpop.permute.xlu0 %1048 }
 0x8ea   :  { %1884 = vrsqrt.f32 %v955_v45  ;;  %1797 = vmatpush3.msra.mxu1 %v1049_v3 }
 0x8eb   :  { %1798 = vmatprep.subr.mxu1 %v1892_v4 }
 0x8ec   :  { %1799 = vmatpush3.msra.mxu1 %v1047_v44 }
 0x8ed   :  { %1800 = vmatprep.subr.mxu1 %v1892_v4  ;;  %v1043_v5 = vpop.permute.xlu0 %1042 }
 0x8ee   :  { %1801 = vmatpush3.msra.mxu1 %v1045_v46 }
 0x8ef   :  { %1802 = vmatprep.subr.mxu1 %v1892_v4 }
 0x8f0   :  { %1803 = vmatpush3.msra.mxu1 %v1043_v5 }
 0x8f1   :  { %1818 = vmatprep.subr.mxu1 %v1997_v15  ;;  %v1144_v50 = vpop.permute.xlu0 %1143 }
 0x8f3   :  { %v1883_v9 = vpop.eup %1882 }
 0x8f4   :  { %v960_v47 = vmul.f32 %v1883_v9, %v944_v10 }
 0x8f5   :  { %v1142_v0 = vpop.permute.xlu0 %1141 }
 0x8f6   :  { %1790 = vmatpush3.msra.mxu0 %v960_v47 }
 0x8f7   :  { %v1885_v48 = vpop.eup %1884  ;;  %1791 = vmatprep.subr.mxu0 %v1892_v4 }
 0x8f8   :  { %v959_v7 = vmul.f32 %v1885_v48, %v943_v38 }
 0x8f9   :  { %v1329_v52 = vpop.permute.xlu0 %1328 }
 0x8fa   :  { %1792 = vmatpush3.msra.mxu0 %v959_v7 }
 0x8fb   :  { %1794 = vmatmul.mubr.msk.f32.vlgmr.msra.gmra.mxu0 %vm124_vm1, %v2177_v23  ;;  %1807 = vmatprep.subr.mxu0 %v1892_v4 }
 0x8fc   :  { %1815 = vmatprep.mubr.msk.f32.mxu0 %vm1893_vm2, %v1892_v4  ;;  %1808 = vmatpush3.msra.mxu0 %v1146_v49 }
 0x8fd   :  { %1809 = vmatprep.subr.mxu0 %v1892_v4  ;;  %v1325_v55 = vpop.permute.xlu0 %1324 }
 0x8fe   :  { %1810 = vmatpush3.msra.mxu0 %v1144_v50 }
 0x8ff   :  { %1811 = vmatprep.subr.mxu0 %v1892_v4 }
 0x900   :  { %1812 = vmatpush3.msra.mxu0 %v1142_v0 }
 0x901   :  { %1813 = vmatprep.subr.mxu0 %v1892_v4  ;;  %v1236_v8 = vpop.permute.xlu0 %1235 }
 0x902   :  { %1814 = vmatpush3.msra.mxu0 %v1140_v51 }
 0x903   :  { %1825 = vmatprep.subr.mxu0 %v1329_v52 }
 0x905   :  { %v1421_v13 = vpop.permute.xlu0 %1420 }
 0x909   :  { %v1515_v29 = vpop.permute.xlu0 %1514 }
 0x90d   :  { %v1511_v31 = vpop.permute.xlu0 %1510 }
 0x9bb   :  { %v1033_v53 = vpop.f32.mrf.mxu0 }
 0x9bc   :  { %1805 = vmatmul.mubr.msk.f32.vlgmr.msra.gmra.mxu1 %vm26_vm0, %v1033_v53 }
 0x9bd   :  { %v1795_v2 = vpop.f32.mrf.mxu0  ;;  %1819 = vmatpush3.msra.mxu1 %v1997_v15  ;;  %1822 = vmatprep.mubr.msk.f32.mxu1 %vm124_vm1, %v1236_v8  ;;  %v1631_v15 = vld [vmem:[%s2224_s1 + $0x62] ss:$0 sm:$0xff] }
 0x9be   :  { %1820 = vmatprep.subr.mxu1 %v2002_v16  ;;  %1523 = vrot.lane.b32.xlu1 %v1631_v15, %s1888_s28 }
 0x9bf   :  { %1821 = vmatpush3.msra.mxu1 %v2002_v16 }
 0x9c0   :  { %1836 = vmatprep.subr.mxu1 %v1892_v4  ;;  %1823 = vmatmul.mubr.msk.f32.vlgmr.msra.gmra.mxu1 %vm124_vm1, %v1238_v57 }
 0x9c1   :  { %1840 = vmatprep.mubr.msk.f32.mxu1 %vm1893_vm2, %v1892_v4 }
 0xa30   :  { %v1524_v34 = vpop.permute.xlu1 %1523 }
 0xa7c   :  { %v1126_v16 = vpop.f32.mrf.mxu1 }
 0xa7d   :  { %v1127_v58 = vadd.f32 %v1126_v16, %v1055_v1 }
 0xa7e   :  { %v1806_v59 = vpop.f32.mrf.mxu1 }
 0xa7f   :  { %v1130_v60 = vmax.f32 %v1127_v58, 0.0 }
 0xa80   :  { %v1824_v11 = vpop.f32.mrf.mxu1 }
 0xa81   :  { %1816 = vmatmul.mubr.msk.f32.vlgmr.msra.gmra.mxu0 %vm26_vm0, %v1130_v60 }
 0xa82   :  { %1826 = vmatpush3.msra.mxu0 %v1329_v52  ;;  %1833 = vmatprep.mubr.msk.f32.mxu0 %vm26_vm0, %v959_v7  ;;  %v1309_v17 = vpop.f32.mrf.mxu1 }
 0xa83   :  { %1827 = vmatprep.subr.mxu0 %v1327_v54 }
 0xa84   :  { %1828 = vmatpush3.msra.mxu0 %v1327_v54 }
 0xa85   :  { %1829 = vmatprep.subr.mxu0 %v1325_v55 }
 0xa86   :  { %1830 = vmatpush3.msra.mxu0 %v1325_v55 }
 0xa87   :  { %1831 = vmatprep.subr.mxu0 %v1323_v56 }
 0xa88   :  { %1832 = vmatpush3.msra.mxu0 %v1323_v56 }
 0xa89   :  { %1834 = vmatmul.mubr.msk.f32.vlgmr.msra.gmra.mxu0 %vm26_vm0, %v960_v47 }
 0xb41   :  { %v1220_v61 = vpop.f32.mrf.mxu0 }
 0xb42   :  { %v1221_v62 = vadd.f32 %v1631_v15, %v1220_v61 }
 0xb43   :  { %v1817_v63 = vpop.f32.mrf.mxu0 }
 0xb44   :  { %1225 = vst.msk [vmem:[%s2226_s2] sm:$0x3] %vm1224_vm3, %v1221_v62 }
 0xb49   :  { %v1835_v12 = vpop.f32.mrf.mxu0 }
 0xb4a   :  { %v1412_v14 = vadd.f32 %v1835_v12, %v1824_v11 }
 0xb4b   :  { %v1406_v18 = vpop.f32.mrf.mxu0 }
 0xb4c   :  { %v1424_v19 = vadd.f32 %v1421_v13, %v1412_v14  ;;  %v1407_v20 = vadd.f32 %v1406_v18, %v1309_v17 }
 0xb4e   :  { %v1426_v21 = vmax.f32 %v1424_v19, 0.0  ;;  %v1423_v26 = vadd.f32 %v1421_v13, %v1407_v20 }
 0xb50   :  { %v1425_v28 = vmax.f32 %v1423_v26, 0.0  ;;  %1837 = vmatpush3.msra.mxu1 %v1426_v21 }
 0xb51   :  { %1838 = vmatprep.subr.mxu1 %v1892_v4 }
 0xb52   :  { %1839 = vmatpush3.msra.mxu1 %v1425_v28 }
 0xb53   :  { %1841 = vmatmul.mubr.msk.f32.vlgmr.msra.gmra.mxu1 %vm124_vm1, %v2177_v23  ;;  %1843 = vmatprep.subr.mxu1 %v1892_v4 }
 0xb54   :  { %1844 = vmatpush3.msra.mxu1 %v1517_v27  ;;  %1851 = vmatprep.mubr.msk.f32.mxu1 %vm1893_vm2, %v1892_v4 }
 0xb55   :  { %1845 = vmatprep.subr.mxu1 %v1892_v4 }
 0xb56   :  { %1846 = vmatpush3.msra.mxu1 %v1515_v29 }
 0xb57   :  { %1847 = vmatprep.subr.mxu1 %v1892_v4 }
 0xb58   :  { %1848 = vmatpush3.msra.mxu1 %v1513_v30 }
 0xb59   :  { %1849 = vmatprep.subr.mxu1 %v1892_v4 }
 0xb5a   :  { %1850 = vmatpush3.msra.mxu1 %v1511_v31 }
 0xc13   :  { %v1493_v32 = vpop.f32.mrf.mxu1 }
 0xc14   :  { %1852 = vmatmul.mubr.msk.f32.vlgmr.msra.gmra.mxu1 %vm26_vm0, %v1493_v32 }
 0xc15   :  { %v1842_v33 = vpop.f32.mrf.mxu1 }
 0xcd4   :  { %v1595_v35 = vpop.f32.mrf.mxu1 }
 0xcd5   :  { %v1596_v36 = vadd.f32 %v1595_v35, %v1524_v34 }
 0xcd6   :  { %v1853_v10 = vpop.f32.mrf.mxu1 }
 0xcd7   :  { %1600 = vst.msk [vmem:[%s2226_s2 + $0x8] sm:$0x3] %vm1599_vm4, %v1596_v36 }

</bundles_post_ra>
